<compile_context>
chip_gen: v7x
topology: tpu7x:2x2x1
jax: 0.10.0
libtpu: 0.0.40
codegen_flags: <defaults>
</compile_context>

<pallas_src>
import jax
import jax.numpy as jnp
from jax.experimental import pallas as pl
from jax.experimental.pallas import tpu as pltpu


LANE = 128
SUBLANE = 8


# ---------------------------------------------------------------------------
# Small helpers
# ---------------------------------------------------------------------------
def _round_up(a, m):
    return ((a + m - 1) // m) * m


def _cdiv(a, b):
    return -(-a // b)


def _device_kind():
    try:
        return jax.devices()[0].device_kind.lower()
    except Exception:
        return ""


def _vmem_capacity_bytes():
    try:
        cap = int(getattr(pltpu.get_tpu_info(), "vmem_capacity_bytes"))
        if cap > 0:
            return cap
    except Exception:
        pass
    # Conservative fallback: v7x has the smallest VMEM (64 MiB per TensorCore).
    return 64 * 1024 * 1024


# ---------------------------------------------------------------------------
# Kernels
# ---------------------------------------------------------------------------
def _resblock_kernel_resident(x_ref, w1_ref, b1_ref, w2_ref, b2_ref, o_ref):
    # x_ref:  (tb, S)   f32 block of the (padded) batch
    # w1_ref: (S, S)    bf16, pre-transposed -> kernel computes x @ w1
    # b1_ref: (1, S)    f32
    # w2_ref: (S, S)    bf16
    # b2_ref: (1, S)    f32
    # fc1: bf16 MXU inputs, f32 accumulation; bias + ReLU in f32 on the VPU.
    h = jnp.dot(x_ref[...].astype(jnp.bfloat16), w1_ref[...],
                preferred_element_type=jnp.float32)
    h = jnp.maximum(h + b1_ref[...], 0.0)
    # dropout: eval-mode semantics -> identity.
    out = jnp.dot(h.astype(jnp.bfloat16), w2_ref[...],
                  preferred_element_type=jnp.float32) + b2_ref[...]
    # Re-read the residual at the store: keeps the f32 x tile live range short.
    o_ref[...] = (x_ref[...] + out).astype(o_ref.dtype)


def _resblock_kernel_ktiled(x_ref, w1_ref, b1_ref, w2_ref, b2_ref, o_ref,
                            acc_ref):
    # Grid = (batch_tiles, k_tiles); k is the hidden-dim slice (fc1 output
    # columns == fc2 contraction rows).  Weight slices stream through VMEM;
    # the f32 accumulator is resident across the k axis.
    k = pl.program_id(1)

    @pl.when(k == 0)
    def _():
        acc_ref[...] = jnp.zeros_like(acc_ref)

    # fc1 slice: h_k = ReLU(x @ w1[:, k*tk:(k+1)*tk] + b1[k-slice])
    h = jnp.dot(x_ref[...].astype(jnp.bfloat16), w1_ref[...],
                preferred_element_type=jnp.float32)
    h = jnp.maximum(h + b1_ref[...], 0.0)
    # dropout: eval-mode semantics -> identity.
    # fc2 partial: acc += h_k @ w2[k*tk:(k+1)*tk, :]
    acc_ref[...] += jnp.dot(h.astype(jnp.bfloat16), w2_ref[...],
                            preferred_element_type=jnp.float32)

    @pl.when(k == pl.num_programs(1) - 1)
    def _():
        o_ref[...] = (x_ref[...] + acc_ref[...] + b2_ref[...]).astype(o_ref.dtype)


# ---------------------------------------------------------------------------
# VMEM planning
# ---------------------------------------------------------------------------
def _resident_vmem_need(tb, s_pad):
    # Conservative: assume every operand is double-buffered.
    weights = 2 * 2 * (s_pad * s_pad * 2)          # w1 + w2 (bf16)
    biases = 2 * 2 * (s_pad * 4)
    io = 2 * 2 * (tb * s_pad * 4)                  # x & out tiles (f32)
    act = 2 * (tb * s_pad * 4)                     # h + headroom
    return weights + biases + io + act


def _ktiled_vmem_need(tb, s_pad, tk):
    weights = 2 * (s_pad * tk * 2 + tk * s_pad * 2)  # w1/w2 slices, dbl-buffered
    biases = 2 * (tk * 4 + s_pad * 4)
    io = 2 * 2 * (tb * s_pad * 4)
    acc = tb * s_pad * 4
    act = 2 * (tb * tk * 4)
    return weights + biases + io + acc + act


def _vmem_limit_bytes(need):
    cap = _vmem_capacity_bytes()
    budget = int(cap * 0.85)                        # ~15% headroom
    return int(min(max(2 * need, 8 * 1024 * 1024), budget))


def _pick_batch_tile(batch, kind):
    # v5e's MXU fills at M=128; 256-row tiles only add VMEM/vreg pressure there.
    tb_max = 128 if "v5" in kind else 256
    full = _round_up(max(batch, 1), SUBLANE)
    tb = min(tb_max, full)
    steps = _cdiv(full, tb)
    # v7x: two TensorCores share the ("parallel",) batch axis; prefer an even
    # number of grid steps so neither core idles on a tail step.
    if "v7" in kind and steps > 1 and steps % 2 == 1:
        tb_alt = _round_up(_cdiv(full, steps + 1), SUBLANE)
        if tb_alt >= SUBLANE:
            tb = tb_alt
    return tb


def _plan(batch, s_pad, kind):
    """Returns (tb, tk); tk is None for the resident-whole-weights path."""
    tb = _pick_batch_tile(batch, kind)
    budget = int(_vmem_capacity_bytes() * 0.7)
    if _resident_vmem_need(tb, s_pad) <= budget:
        return tb, None
    # Hidden-dim tiling: shrink the weight slice (multiple of 128, divides
    # s_pad) until it fits the budget.
    tk = s_pad
    while tk > LANE:
        half = tk // 2
        if s_pad % half != 0 or half % LANE != 0:
            break
        tk = half
        if _ktiled_vmem_need(tb, s_pad, tk) <= budget:
            break
    # If still too big, shrink the batch tile as well.
    while _ktiled_vmem_need(tb, s_pad, tk) > budget and tb > SUBLANE:
        tb = max(SUBLANE, _round_up(tb // 2, SUBLANE))
    return tb, tk


# ---------------------------------------------------------------------------
# pallas_call wrappers
# ---------------------------------------------------------------------------
def _cost_estimate(b_pad, s_pad):
    flops = 4 * b_pad * s_pad * s_pad                       # two matmuls
    bytes_accessed = (2 * s_pad * s_pad * 2                 # bf16 weights
                      + 4 * s_pad * 4                       # biases
                      + 2 * b_pad * s_pad * 4)              # x in + out
    return pl.CostEstimate(flops=flops, transcendentals=0,
                           bytes_accessed=bytes_accessed)


def _call_resident(x_pad, p, tb, vmem_limit):
    b_pad, s_pad = x_pad.shape
    return pl.pallas_call(
        _resblock_kernel_resident,
        out_shape=jax.ShapeDtypeStruct((b_pad, s_pad), x_pad.dtype),
        grid_spec=pltpu.PrefetchScalarGridSpec(
            num_scalar_prefetch=0,
            grid=(b_pad // tb,),
            in_specs=[
                pl.BlockSpec((tb, s_pad), lambda i: (i, 0)),        # x tile
                pl.BlockSpec((s_pad, s_pad), lambda i: (0, 0)),     # w1
                pl.BlockSpec((1, s_pad), lambda i: (0, 0)),         # b1
                pl.BlockSpec((s_pad, s_pad), lambda i: (0, 0)),     # w2
                pl.BlockSpec((1, s_pad), lambda i: (0, 0)),         # b2
            ],
            out_specs=pl.BlockSpec((tb, s_pad), lambda i: (i, 0)),
        ),
        compiler_params=pltpu.CompilerParams(
            dimension_semantics=("parallel",),
            vmem_limit_bytes=vmem_limit,
        ),
        cost_estimate=_cost_estimate(b_pad, s_pad),
    )(x_pad, p["w1"], p["b1"], p["w2"], p["b2"])


def _call_ktiled(x_pad, p, tb, tk, vmem_limit):
    b_pad, s_pad = x_pad.shape
    return pl.pallas_call(
        _resblock_kernel_ktiled,
        out_shape=jax.ShapeDtypeStruct((b_pad, s_pad), x_pad.dtype),
        grid_spec=pltpu.PrefetchScalarGridSpec(
            num_scalar_prefetch=0,
            grid=(b_pad // tb, s_pad // tk),
            in_specs=[
                pl.BlockSpec((tb, s_pad), lambda i, k: (i, 0)),     # x tile
                pl.BlockSpec((s_pad, tk), lambda i, k: (0, k)),     # w1 slice
                pl.BlockSpec((1, tk), lambda i, k: (0, k)),         # b1 slice
                pl.BlockSpec((tk, s_pad), lambda i, k: (k, 0)),     # w2 slice
                pl.BlockSpec((1, s_pad), lambda i, k: (0, 0)),      # b2
            ],
            out_specs=pl.BlockSpec((tb, s_pad), lambda i, k: (i, 0)),
            scratch_shapes=[pltpu.VMEM((tb, s_pad), jnp.float32)],
        ),
        compiler_params=pltpu.CompilerParams(
            dimension_semantics=("parallel", "arbitrary"),
            vmem_limit_bytes=vmem_limit,
        ),
        cost_estimate=_cost_estimate(b_pad, s_pad),
    )(x_pad, p["w1"], p["b1"], p["w2"], p["b2"])


# ---------------------------------------------------------------------------
# Public API
# ---------------------------------------------------------------------------
def prepare_params(w1, b1, w2, b2):
    """One-time prep: pad the feature axis to a lane-dense multiple of 128 and
    pre-cast weights to bf16 (native MXU input format).  Done once at init so
    the per-call path never re-reads/re-writes the weights through HBM."""
    S = w1.shape[0]
    assert w1.shape == (S, S) and w2.shape == (S, S)
    assert b1.shape == (S,) and b2.shape == (S,)
    s_pad = _round_up(S, LANE)
    pw = ((0, s_pad - S), (0, s_pad - S))
    pb = (0, s_pad - S)
    return dict(
        size=S,
        s_pad=s_pad,
        w1=jnp.pad(w1, pw).astype(jnp.bfloat16),
        w2=jnp.pad(w2, pw).astype(jnp.bfloat16),
        b1=jnp.pad(b1, pb).reshape(1, s_pad).astype(jnp.float32),
        b2=jnp.pad(b2, pb).reshape(1, s_pad).astype(jnp.float32),
    )


def resblock_forward(x, params, *, force_tk=None):
    """x: [B, S] float32.  params: output of prepare_params (weights stored in
    [in, out] layout so the kernel computes x @ w).

    Zero padding is exact: padded hidden columns are ReLU(0 + 0) = 0 and
    contribute nothing; padded rows / feature columns are sliced off.
    """
    B, S = x.shape
    assert S == params["size"]
    s_pad = params["s_pad"]
    kind = _device_kind()

    if force_tk is not None:
        tb = _pick_batch_tile(B, kind)
        tk = force_tk
        assert s_pad % tk == 0 and tk % LANE == 0
    else:
        tb, tk = _plan(B, s_pad, kind)

    b_pad = _round_up(B, tb)
    x_pad = jnp.pad(x, ((0, b_pad - B), (0, s_pad - S)))

    if tk is None:
        out = _call_resident(x_pad, params, tb,
                             _vmem_limit_bytes(_resident_vmem_need(tb, s_pad)))
    else:
        out = _call_ktiled(x_pad, params, tb, tk,
                           _vmem_limit_bytes(_ktiled_vmem_need(tb, s_pad, tk)))
    return out[:B, :S]


# ---------------------------------------------------------------------------
# References & init
# ---------------------------------------------------------------------------
def resblock_reference_f32(x, w1, b1, w2, b2):
    h = jnp.maximum(x @ w1 + b1, 0.0)
    return x + (h @ w2 + b2)


def resblock_reference_bf16(x, w1, b1, w2, b2):
    """Pure-JAX reference matching kernel numerics: bf16 MXU inputs, f32 acc."""
    h = jnp.dot(x.astype(jnp.bfloat16), w1.astype(jnp.bfloat16),
                preferred_element_type=jnp.float32) + b1
    h = jnp.maximum(h, 0.0)
    out = jnp.dot(h.astype(jnp.bfloat16), w2.astype(jnp.bfloat16),
                  preferred_element_type=jnp.float32) + b2
    return x + out


def init_params(key, size):
    """Deterministic init mirroring nn.Linear's U(-1/sqrt(size), 1/sqrt(size)).
    Weights are stored already transposed to [in, out]."""
    k1, k2, k3, k4 = jax.random.split(key, 4)
    bound = 1.0 / jnp.sqrt(size)
    w1 = jax.random.uniform(k1, (size, size), jnp.float32, -bound, bound)
    b1 = jax.random.uniform(k2, (size,), jnp.float32, -bound, bound)
    w2 = jax.random.uniform(k3, (size, size), jnp.float32, -bound, bound)
    b2 = jax.random.uniform(k4, (size,), jnp.float32, -bound, bound)
    return w1, b1, w2, b2


if __name__ == "__main__":
    key = jax.random.PRNGKey(0)
    kx, kp, kx2, kp2 = jax.random.split(key, 4)

    # --- small case (resident-weights path) -------------------------------
    batch, size = 16, 32
    x = jax.random.normal(kx, (batch, size), jnp.float32)
    w1, b1, w2, b2 = init_params(kp, size)
    params = prepare_params(w1, b1, w2, b2)      # one-time weight pad + cast

    out = jax.block_until_ready(resblock_forward(x, params))
    assert out.shape == x.shape and out.dtype == x.dtype
    ref_bf16 = resblock_reference_bf16(x, w1, b1, w2, b2)
    ref_f32 = resblock_reference_f32(x, w1, b1, w2, b2)
    assert jnp.allclose(out, ref_bf16, atol=2e-3, rtol=2e-3), \
        "mismatch vs bf16-matched reference (resident path)"
    assert jnp.allclose(out, ref_f32, atol=1e-1, rtol=5e-2), \
        "mismatch vs f32 reference (resident path)"

    # --- hidden-dim-tiled path (forced, 2 k-steps) -------------------------
    batch2, size2 = 16, 256
    x2 = jax.random.normal(kx2, (batch2, size2), jnp.float32)
    w1b, b1b, w2b, b2b = init_params(kp2, size2)
    params2 = prepare_params(w1b, b1b, w2b, b2b)

    out2 = jax.block_until_ready(resblock_forward(x2, params2, force_tk=128))
    ref2_bf16 = resblock_reference_bf16(x2, w1b, b1b, w2b, b2b)
    ref2_f32 = resblock_reference_f32(x2, w1b, b1b, w2b, b2b)
    assert out2.shape == x2.shape and out2.dtype == x2.dtype
    assert jnp.allclose(out2, ref2_bf16, atol=2e-3, rtol=2e-3), \
        "mismatch vs bf16-matched reference (k-tiled path)"
    assert jnp.allclose(out2, ref2_f32, atol=1e-1, rtol=5e-2), \
        "mismatch vs f32 reference (k-tiled path)"

    print("KERNEL_OK")
</pallas_src>

<mosaic_0001>
module attributes {stable_mosaic.version = 11 : i64} {
  func.func @_resblock_kernel_resident(%arg0: i32, %arg1: memref<16x128xf32, #tpu.memory_space<vmem>>, %arg2: memref<128x128xbf16, #tpu.memory_space<vmem>>, %arg3: memref<1x128xf32, #tpu.memory_space<vmem>>, %arg4: memref<128x128xbf16, #tpu.memory_space<vmem>>, %arg5: memref<1x128xf32, #tpu.memory_space<vmem>>, %arg6: memref<16x128xf32, #tpu.memory_space<vmem>>) attributes {dimension_semantics = [#tpu.dimension_semantics<parallel>], iteration_bounds = array<i64: 1>, scalar_prefetch = 0 : i64, scratch_operands = 0 : i64, tpu.core_type = #tpu.core_type<tc>, window_params = [{transform_indices = @transform_0, window_bounds = array<i64: 16, 128>}, {pipeline_mode = #tpu.pipeline_mode<synchronous>, transform_indices = @transform_1, window_bounds = array<i64: 128, 128>}, {pipeline_mode = #tpu.pipeline_mode<synchronous>, transform_indices = @transform_2, window_bounds = array<i64: 1, 128>}, {pipeline_mode = #tpu.pipeline_mode<synchronous>, transform_indices = @transform_3, window_bounds = array<i64: 128, 128>}, {pipeline_mode = #tpu.pipeline_mode<synchronous>, transform_indices = @transform_4, window_bounds = array<i64: 1, 128>}, {transform_indices = @transform_5, window_bounds = array<i64: 16, 128>}]} {
    %c0 = arith.constant 0 : index
    %c0_0 = arith.constant 0 : index
    %0 = vector.load %arg1[%c0, %c0_0] : memref<16x128xf32, #tpu.memory_space<vmem>>, vector<16x128xf32>
    %1 = arith.truncf %0 : vector<16x128xf32> to vector<16x128xbf16>
    %c0_1 = arith.constant 0 : index
    %c0_2 = arith.constant 0 : index
    %2 = vector.load %arg2[%c0_1, %c0_2] : memref<128x128xbf16, #tpu.memory_space<vmem>>, vector<128x128xbf16>
    %cst = arith.constant dense<0.000000e+00> : vector<16x128xf32>
    %3 = tpu.matmul %1, %2, %cst {dimension_numbers = #tpu.dot_dimension_numbers<[1], [0], [0], [1], [0, 0, 1, 1], [], []>} : vector<16x128xbf16>, vector<128x128xbf16>, vector<16x128xf32> -> vector<16x128xf32>
    %c0_3 = arith.constant 0 : index
    %c0_4 = arith.constant 0 : index
    %4 = vector.load %arg3[%c0_3, %c0_4] : memref<1x128xf32, #tpu.memory_space<vmem>>, vector<1x128xf32>
    %5 = vector.broadcast %4 : vector<1x128xf32> to vector<16x128xf32>
    %6 = arith.addf %3, %5 : vector<16x128xf32>
    %cst_5 = arith.constant 0.000000e+00 : f32
    %7 = vector.broadcast %cst_5 : f32 to vector<16x128xf32>
    %8 = arith.maximumf %6, %7 : vector<16x128xf32>
    %9 = arith.truncf %8 : vector<16x128xf32> to vector<16x128xbf16>
    %c0_6 = arith.constant 0 : index
    %c0_7 = arith.constant 0 : index
    %10 = vector.load %arg4[%c0_6, %c0_7] : memref<128x128xbf16, #tpu.memory_space<vmem>>, vector<128x128xbf16>
    %cst_8 = arith.constant dense<0.000000e+00> : vector<16x128xf32>
    %11 = tpu.matmul %9, %10, %cst_8 {dimension_numbers = #tpu.dot_dimension_numbers<[1], [0], [0], [1], [0, 0, 1, 1], [], []>} : vector<16x128xbf16>, vector<128x128xbf16>, vector<16x128xf32> -> vector<16x128xf32>
    %c0_9 = arith.constant 0 : index
    %c0_10 = arith.constant 0 : index
    %12 = vector.load %arg5[%c0_9, %c0_10] : memref<1x128xf32, #tpu.memory_space<vmem>>, vector<1x128xf32>
    %13 = vector.broadcast %12 : vector<1x128xf32> to vector<16x128xf32>
    %14 = arith.addf %11, %13 : vector<16x128xf32>
    %c0_11 = arith.constant 0 : index
    %c0_12 = arith.constant 0 : index
    %15 = vector.load %arg1[%c0_11, %c0_12] : memref<16x128xf32, #tpu.memory_space<vmem>>, vector<16x128xf32>
    %16 = arith.addf %15, %14 : vector<16x128xf32>
    %c0_13 = arith.constant 0 : index
    %c0_14 = arith.constant 0 : index
    %17 = vector.load %arg6[%c0_13, %c0_14] : memref<16x128xf32, #tpu.memory_space<vmem>>, vector<16x128xf32>
    tpu.vector_store %arg6[%c0_13, %c0_14], %16 {strides = array<i32>} : memref<16x128xf32, #tpu.memory_space<vmem>>, vector<16x128xf32>,
    return
  }
  func.func @transform_0(%arg0: i32) -> (i32, i32) {
    %c0_i32 = arith.constant 0 : i32
    %c0_i32_0 = arith.constant 0 : i32
    return %arg0, %c0_i32 : i32, i32
  }
  func.func @transform_1(%arg0: i32) -> (i32, i32) {
    %c0_i32 = arith.constant 0 : i32
    %c0_i32_0 = arith.constant 0 : i32
    %c0_i32_1 = arith.constant 0 : i32
    return %c0_i32, %c0_i32_0 : i32, i32
  }
  func.func @transform_2(%arg0: i32) -> (i32, i32) {
    %c0_i32 = arith.constant 0 : i32
    %c0_i32_0 = arith.constant 0 : i32
    %c0_i32_1 = arith.constant 0 : i32
    return %c0_i32, %c0_i32_0 : i32, i32
  }
  func.func @transform_3(%arg0: i32) -> (i32, i32) {
    %c0_i32 = arith.constant 0 : i32
    %c0_i32_0 = arith.constant 0 : i32
    %c0_i32_1 = arith.constant 0 : i32
    return %c0_i32, %c0_i32_0 : i32, i32
  }
  func.func @transform_4(%arg0: i32) -> (i32, i32) {
    %c0_i32 = arith.constant 0 : i32
    %c0_i32_0 = arith.constant 0 : i32
    %c0_i32_1 = arith.constant 0 : i32
    return %c0_i32, %c0_i32_0 : i32, i32
  }
  func.func @transform_5(%arg0: i32) -> (i32, i32) {
    %c0_i32 = arith.constant 0 : i32
    %c0_i32_0 = arith.constant 0 : i32
    return %arg0, %c0_i32 : i32, i32
  }
}

</mosaic_0001>

<bundles_post_ra>
// kernel: tpu_custom_call.1
= control target key start
LH: loop header
LB: loop body
LE: loop exit
PB: predicated region body
PF: predicated region fallthrough
CT: control target
= control target key end

     0   :  { %10 = vsyncpa [#allocation3], 0  ;;  %s617_s0 = inlined_call_operand.hbm [shape: f32[16,128], index: 0, kind: input, shape index: {}]   ;;  %s618_s1 = inlined_call_operand.hbm [shape: bf16[128,128], index: 1, kind: input, shape index: {}]   ;;  %s619_s2 = inlined_call_operand.vmem [shape: f32[1,128], index: 2, kind: input, shape index: {}]   ;;  %s620_s3 = inlined_call_operand.hbm [shape: bf16[128,128], index: 3, kind: input, shape index: {}]   ;;  %s621_s4 = inlined_call_operand.vmem [shape: f32[1,128], index: 4, kind: input, shape index: {}]   ;;  %s622_s5 = inlined_call_operand.hbm [shape: f32[16,128], index: 5, kind: output, shape index: {}]  }
   0x1   :  { %11 = vsyncpa [#allocation6], 0 }
   0x2   :  { %12 = vsyncpa [#allocation4], 0  ;;  %s511_s18 = smov [#allocation5]   ;;  %s417_s22 = scalar_lea.hbm %s618_s1, 1024 }
   0x3   :  { %s30_s19 = sshll.u32 %s511_s18, 4  ;;  %p418_p0 = scmp.ne.s32.totalorder %s618_s1, %s417_s22  ;;  %s31_s19 = int_to_ptr.vmem [resolvable:$true] %s30_s19 }
   0x4   :  { %p421_p1 = scmp.lt.u32.totalorder %s417_s22, %s618_s1 }
   0x6   :  { %p423_p2 = pnand %p421_p1, %p418_p0 }
   0x8   :  { %426 = shalt.err (!%p423_p2)
}
   0x9   :  { %s427_s27 = scalar_lea.vmem %s31_s19, 1024  ;;  %p432_p4 = scmp.lt.s32.totalorder %s31_s19, %s31_s19 }
   0xa   :  { %p428_p3 = scmp.ne.s32.totalorder %s31_s19, %s427_s27  ;;  %p433_p5 = scmp.lt.s32.totalorder %s427_s27, %s427_s27 }
   0xc   :  { %p434_p6 = por %p433_p5, %p432_p4 }
   0xe   :  { %p435_p7 = pnand %p434_p6, %p428_p3 }
  0x10   :  { %438 = shalt.err (!%p435_p7)
}
  0x11   :  { %s512_s28 = smov 64   ;;  %s513_s29 = smov 4  }
  0x12   :  { %36 = dma.hbm_to_vmem [thread:$0]  %s618_s1, 1024, %s31_s19, [#allocation6], %s512_s28, %s512_s28, %s513_s29  }
  0x13   :  { %s514_s7 = smov [#allocation2]   ;;  %s439_s11 = scalar_lea.hbm %s617_s0, 256 }
  0x14   :  { %s18_s8 = sshll.u32 %s514_s7, 4  ;;  %p440_p8 = scmp.ne.s32.totalorder %s617_s0, %s439_s11  ;;  %s19_s8 = int_to_ptr.vmem [resolvable:$true] %s18_s8 }
  0x15   :  { %p443_p9 = scmp.lt.u32.totalorder %s439_s11, %s617_s0 }
  0x17   :  { %p445_p10 = pnand %p443_p9, %p440_p8 }
  0x19   :  { %448 = shalt.err (!%p445_p10)
}
  0x1a   :  { %s449_s16 = scalar_lea.vmem %s19_s8, 256  ;;  %p454_p12 = scmp.lt.s32.totalorder %s19_s8, %s19_s8 }
  0x1b   :  { %p450_p11 = scmp.ne.s32.totalorder %s19_s8, %s449_s16  ;;  %p455_p13 = scmp.lt.s32.totalorder %s449_s16, %s449_s16 }
  0x1d   :  { %p456_p0 = por %p455_p13, %p454_p12 }
  0x1f   :  { %p457_p1 = pnand %p456_p0, %p450_p11 }
  0x21   :  { %460 = shalt.err (!%p457_p1)
}
  0x22   :  { %s515_s1 = smov 128   ;;  %s516_s17 = smov 8  }
  0x23   :  { %24 = dma.hbm_to_vmem [thread:$0]  %s617_s0, 256, %s19_s8, [#allocation3], %s515_s1, %s515_s1, %s516_s17  }
  0x24   :  { %s517_s20 = smov [#allocation7]   ;;  %s461_s24 = scalar_lea.hbm %s620_s3, 1024 }
  0x25   :  { %s44_s21 = sshll.u32 %s517_s20, 4  ;;  %p462_p2 = scmp.ne.s32.totalorder %s620_s3, %s461_s24  ;;  %s45_s21 = int_to_ptr.vmem [resolvable:$true] %s44_s21 }
  0x26   :  { %p465_p3 = scmp.lt.u32.totalorder %s461_s24, %s620_s3 }
  0x28   :  { %p467_p4 = pnand %p465_p3, %p462_p2 }
  0x2a   :  { %470 = shalt.err (!%p467_p4)
}
  0x2b   :  { %s471_s6 = scalar_lea.vmem %s45_s21, 1024  ;;  %p476_p6 = scmp.lt.s32.totalorder %s45_s21, %s45_s21 }
  0x2c   :  { %p472_p5 = scmp.ne.s32.totalorder %s45_s21, %s471_s6  ;;  %p477_p7 = scmp.lt.s32.totalorder %s471_s6, %s471_s6 }
  0x2e   :  { %p478_p8 = por %p477_p7, %p476_p6 }
  0x30   :  { %p479_p9 = pnand %p478_p8, %p472_p5 }
  0x32   :  { %482 = shalt.err (!%p479_p9)
}
  0x33   :  { %50 = dma.hbm_to_vmem [thread:$0]  %s620_s3, 1024, %s45_s21, [#allocation6], %s512_s28, %s512_s28, %s513_s29  }
  0x34   :  { %505 = dma.done.wait [#allocation3], 256  }
  0x35   :  { %506 = vsyncadd [#allocation3], 4294967040 }
  0x36   :  { %507 = dma.done.wait [#allocation6], 2048  }
  0x37   :  { %508 = vsyncadd [#allocation6], 4294965248  ;;  %v518_v0 = vmov 0.0   ;;  %vm519_vm0 = vmmov 0   ;;  %v401_v1 = vld [vmem:[#allocation5] sm:$0xff]   ;;  %v402_v2 = vld [vmem:[#allocation5 + $0x8] sm:$0xff]  }
  0x38   :  { %351 = vmatprep.subr.bf16.mxu0 %v518_v0  ;;  %367 = vmatprep.mubr.msk.bf16.mxu0 %vm519_vm0, %v518_v0  ;;  %v403_v3 = vld [vmem:[#allocation5 + $0x10] sm:$0xff]   ;;  %v409_v4 = vld [vmem:[#allocation7] sm:$0xff]   ;;  %v404_v5 = vld [vmem:[#allocation5 + $0x18] sm:$0xff]   ;;  %s520_s9 = smov [#allocation8]  }
  0x39   :  { %371 = vmatprep.subr.bf16.mxu1 %v518_v0  ;;  %387 = vmatprep.mubr.msk.bf16.mxu1 %vm519_vm0, %v518_v0  ;;  %v410_v6 = vld [vmem:[#allocation7 + $0x8] sm:$0xff]   ;;  %v405_v7 = vld [vmem:[#allocation5 + $0x20] sm:$0xff]   ;;  %v411_v8 = vld [vmem:[#allocation7 + $0x10] sm:$0xff]  }
  0x3a   :  { %352 = vmatpush3.bf16.msra.mxu0 %v401_v1  ;;  %372 = vmatpush3.bf16.msra.mxu1 %v409_v4  ;;  %v406_v9 = vld [vmem:[#allocation5 + $0x28] sm:$0xff]   ;;  %v412_v10 = vld [vmem:[#allocation7 + $0x18] sm:$0xff]   ;;  %v407_v11 = vld [vmem:[#allocation5 + $0x30] sm:$0xff]  }
  0x3b   :  { %353 = vmatprep.subr.bf16.mxu0 %v518_v0  ;;  %373 = vmatprep.subr.bf16.mxu1 %v518_v0  ;;  %v413_v12 = vld [vmem:[#allocation7 + $0x20] sm:$0xff]   ;;  %v408_v13 = vld [vmem:[#allocation5 + $0x38] sm:$0xff]   ;;  %v63_v14 = vld [vmem:[#allocation2] sm:$0xff] }
  0x3c   :  { %v64_v15 = vld [vmem:[#allocation2 + $0x8] sm:$0xff]  ;;  %v414_v16 = vld [vmem:[#allocation7 + $0x28] sm:$0xff]   ;;  %v415_v18 = vld [vmem:[#allocation7 + $0x30] sm:$0xff]  }
  0x3d   :  { %v65_v17 = vpack.c.bf16 %v64_v15, %v63_v14  ;;  %v416_v19 = vld [vmem:[#allocation7 + $0x38] sm:$0xff]   ;;  %v315_v20 = vld [vmem:[%s619_s2] ss:$0 sm:$0xff]  ;;  %s302_s2 = sshll.u32 %s520_s9, 4  ;;  %s303_s2 = int_to_ptr.vmem [resolvable:$true] %s302_s2 }
  0x3e   :  { %354 = vmatpush3.bf16.msra.mxu0 %v402_v2  ;;  %374 = vmatpush3.bf16.msra.mxu1 %v410_v6  ;;  %v324_v30 = vld [vmem:[%s621_s4] ss:$0 sm:$0xff]  ;;  %s483_s10 = scalar_lea.vmem %s303_s2, 256  ;;  %p488_p11 = scmp.lt.s32.totalorder %s303_s2, %s303_s2 }
  0x3f   :  { %355 = vmatprep.subr.bf16.mxu0 %v518_v0  ;;  %375 = vmatprep.subr.bf16.mxu1 %v518_v0  ;;  %p484_p10 = scmp.ne.s32.totalorder %s303_s2, %s483_s10  ;;  %p489_p12 = scmp.lt.s32.totalorder %s483_s10, %s483_s10 }
  0x41   :  { %p490_p13 = por %p489_p12, %p488_p11 }
  0x42   :  { %356 = vmatpush3.bf16.msra.mxu0 %v403_v3  ;;  %376 = vmatpush3.bf16.msra.mxu1 %v411_v8 }
  0x43   :  { %357 = vmatprep.subr.bf16.mxu0 %v518_v0  ;;  %377 = vmatprep.subr.bf16.mxu1 %v518_v0  ;;  %p491_p0 = pnand %p490_p13, %p484_p10 }
  0x46   :  { %358 = vmatpush3.bf16.msra.mxu0 %v404_v5  ;;  %378 = vmatpush3.bf16.msra.mxu1 %v412_v10 }
  0x47   :  { %359 = vmatprep.subr.bf16.mxu0 %v518_v0  ;;  %379 = vmatprep.subr.bf16.mxu1 %v518_v0 }
  0x4a   :  { %360 = vmatpush3.bf16.msra.mxu0 %v405_v7  ;;  %380 = vmatpush3.bf16.msra.mxu1 %v413_v12 }
  0x4b   :  { %361 = vmatprep.subr.bf16.mxu0 %v518_v0  ;;  %381 = vmatprep.subr.bf16.mxu1 %v518_v0 }
  0x4e   :  { %362 = vmatpush3.bf16.msra.mxu0 %v406_v9  ;;  %382 = vmatpush3.bf16.msra.mxu1 %v414_v16 }
  0x4f   :  { %363 = vmatprep.subr.bf16.mxu0 %v518_v0  ;;  %383 = vmatprep.subr.bf16.mxu1 %v518_v0 }
  0x52   :  { %364 = vmatpush3.bf16.msra.mxu0 %v407_v11  ;;  %384 = vmatpush3.bf16.msra.mxu1 %v415_v18 }
  0x53   :  { %365 = vmatprep.subr.bf16.mxu0 %v518_v0  ;;  %385 = vmatprep.subr.bf16.mxu1 %v518_v0 }
  0x56   :  { %366 = vmatpush3.bf16.msra.mxu0 %v408_v13  ;;  %386 = vmatpush3.bf16.msra.mxu1 %v416_v19 }
  0x59   :  { %368 = vmatmul.mubr.bf16.vlgmr.msra.gmra.mrb[0].mxu0 %v65_v17 }
 0x12c   :  { %v171_v21 = vpop.f32.mrb[0].mxu0 }
 0x12d   :  { %v172_v22 = vadd.f32 %v315_v20, %v171_v21  ;;  %v369_v23 = vpop.f32.mrb[1].mxu0 }
 0x12e   :  { %v174_v24 = vpop.f32.mrb[2].mxu0 }
 0x12f   :  { %v175_v25 = vadd.f32 %v315_v20, %v174_v24  ;;  %v370_v26 = vpop.f32.mrb[3].mxu0  ;;  %v178_v27 = vmax.f32 %v172_v22, 0.0 }
 0x131   :  { %v179_v28 = vmax.f32 %v175_v25, 0.0 }
 0x133   :  { %v180_v29 = vpack.c.bf16 %v179_v28, %v178_v27 }
 0x135   :  { %388 = vmatmul.mubr.bf16.vlgmr.msra.gmra.mrb[0].mxu1 %v180_v29 }
 0x208   :  { %v286_v31 = vpop.f32.mrb[0].mxu1 }
 0x209   :  { %v287_v32 = vadd.f32 %v324_v30, %v286_v31  ;;  %v389_v33 = vpop.f32.mrb[1].mxu1 }
 0x20a   :  { %v289_v34 = vpop.f32.mrb[2].mxu1 }
 0x20b   :  { %v293_v35 = vadd.f32 %v287_v32, %v63_v14  ;;  %v290_v36 = vadd.f32 %v324_v30, %v289_v34  ;;  %v390_v37 = vpop.f32.mrb[3].mxu1 }
 0x20d   :  { %295 = vst [vmem:[#allocation8] sm:$0xff] %v293_v35  ;;  %v294_v38 = vadd.f32 %v290_v36, %v64_v15 }
 0x20f   :  { %296 = vst [vmem:[#allocation8 + $0x8] sm:$0xff] %v294_v38 }
 0x210   :  { %494 = shalt.err (!%p491_p0)
}
 0x211   :  { %s495_s12 = scalar_lea.hbm %s622_s5, 256 }
 0x212   :  { %p496_p1 = scmp.ne.s32.totalorder %s622_s5, %s495_s12  ;;  %p499_p2 = scmp.lt.u32.totalorder %s495_s12, %s622_s5 }
 0x214   :  { %p501_p3 = pnand %p499_p2, %p496_p1 }
 0x216   :  { %504 = shalt.err (!%p501_p3)
}
 0x217   :  { %308 = dma.vmem_to_hbm [thread:$0]  %s303_s2, 256, %s622_s5, [#allocation4], %s515_s1, %s515_s1, %s516_s17  }
 0x218   :  { %509 = dma.done.wait [#allocation4], 256  }
 0x219   :  { %510 = vsyncadd [#allocation4], 4294967040 }
 0x21a   :  { %312 = vsyncpa [#allocation3], 1 }
 0x21b   :  { %313 = vsyncpa [#allocation6], 1 }
 0x21c   :  { %314 = vsyncpa [#allocation4], 1 }

</bundles_post_ra>
